<compile_context>
chip_gen: v6e
topology: v6e:2x2x1
jax: 0.10.0
libtpu: 0.0.40
codegen_flags: <defaults>
</compile_context>

<pallas_src>
import jax
import jax.numpy as jnp
from jax.experimental import pallas as pl
from jax.experimental.pallas import tpu as pltpu

_EPS = 1e-5        # nn.LayerNorm default eps
_TAPS = 3          # torch.roll shifts -3..+3  -> 7-tap average


# ------------------------------ fused kernel ------------------------------- #
def _network12_kernel(x_ref, wk0_ref, wkm_ref, wkp_ref, beff_ref, o_ref):
    x = x_ref[...]                                           # (B, Din) f32

    # ---- LayerNorm over the feature axis (affine folded into the weights) ----
    mu = jnp.mean(x, axis=-1, keepdims=True)
    xc = x - mu
    var = jnp.mean(xc * xc, axis=-1, keepdims=True)          # biased var (PyTorch)
    xn = xc * jax.lax.rsqrt(var + _EPS)                      # (B, Din)

    B = xn.shape[0]
    # +/-1-row circular neighbors (the flattened 7-tap roll spills at most one row
    # because output_size >= 7).  Sublane rotation -> XLU slot, no MXU push.
    xn_prev = pltpu.roll(xn, 1, axis=0)        # row b <- row (b-1) % B
    xn_next = pltpu.roll(xn, B - 1, axis=0)    # row b <- row (b+1) % B

    # ---- whole (identity-activation) linear chain + 7-tap average, pre-folded ----
    acc = (jnp.dot(xn,      wk0_ref[...], preferred_element_type=jnp.float32)
           + jnp.dot(xn_prev, wkm_ref[...], preferred_element_type=jnp.float32)
           + jnp.dot(xn_next, wkp_ref[...], preferred_element_type=jnp.float32)
           + beff_ref[...])

    # ---- sigmoid(x) * 2*pi  (logistic routes to the EUP) ----
    o_ref[...] = (2.0 * jnp.pi) * jax.nn.sigmoid(acc)


# -------------------------------- wrapper ---------------------------------- #
def _forward_pallas(x, wk0, wkm, wkp, beff):
    B, _ = x.shape
    O = wk0.shape[1]
    assert O >= 2 * _TAPS + 1, "output_size must be >= 7 for the banded roll decomposition"
    vmem = lambda: pl.BlockSpec(memory_space=pltpu.MemorySpace.VMEM)
    return pl.pallas_call(
        _network12_kernel,
        out_shape=jax.ShapeDtypeStruct((B, O), jnp.float32),
        in_specs=[vmem() for _ in range(5)],
        out_specs=vmem(),
    )(x, wk0, wkm, wkp, beff)


def network_12_forward(x, params):
    return _forward_pallas(x, params["wk0"], params["wkm"], params["wkp"], params["beff"])


# ------------------------------- parameters -------------------------------- #
def _band_matrices(O, T=_TAPS):
    # out[b, j] = mean_{d=-3..3} flat[(b*O + j + d) mod (B*O)]
    #           = ( y @ S0  +  y_prev @ Sm  +  y_next @ Sp ) / 7
    i = jnp.arange(O, dtype=jnp.int32)[:, None]
    j = jnp.arange(O, dtype=jnp.int32)[None, :]
    d = i - j
    s0 = ((d >= -T) & (d <= T)).astype(jnp.float32)           # same-row taps
    sm = ((d >= O - T) & (d <= O - 1)).astype(jnp.float32)     # previous-row tail
    sp = ((-d >= O - T) & (-d <= O - 1)).astype(jnp.float32)   # next-row head
    return s0, sm, sp


def init_params(key, input_size, n, output_size):
    assert output_size >= 2 * _TAPS + 1
    ks = jax.random.split(key, 6)

    def rnd(k, shape, scale):
        return scale * jax.random.normal(k, shape, jnp.float32)

    p = {
        "ln_g": 1.0 + rnd(ks[0], (input_size,), 0.1),   # LayerNorm weight
        "ln_b": rnd(ks[1], (input_size,), 0.1),         # LayerNorm bias
        "w1": rnd(ks[2], (input_size, n), 0.05),
        "b1": rnd(ks[3], (1, n), 0.05),
        "w3": rnd(ks[4], (n, output_size), 0.05),
        "b3": rnd(ks[5], (1, output_size), 0.05),
    }

    # --- inference-time folds (exact up to f32 re-association) ---
    # LayerNorm affine into linear_1:
    w1f = p["ln_g"][:, None] * p["w1"]
    b1f = p["ln_b"][None, :] @ p["w1"] + p["b1"]
    # LeakyReLU(negative_slope=1) == identity, so Linear1 -> Linear3 collapses:
    w_full = w1f @ p["w3"]                             # (Din, O)
    b_full = b1f @ p["w3"] + p["b3"]                   # (1, O)
    # Fold the 7-tap flattened circular average into the weights:
    s0, sm, sp = _band_matrices(output_size)
    p["wk0"] = (w_full @ s0) / 7.0
    p["wkm"] = (w_full @ sm) / 7.0
    p["wkp"] = (w_full @ sp) / 7.0
    p["beff"] = (b_full @ (s0 + sm + sp)) / 7.0
    return p


# ------------------------- pure-JAX reference check ------------------------ #
def reference_forward(x, p):
    mu = jnp.mean(x, axis=-1, keepdims=True)
    var = jnp.mean((x - mu) ** 2, axis=-1, keepdims=True)
    xn = (x - mu) / jnp.sqrt(var + _EPS) * p["ln_g"][None, :] + p["ln_b"][None, :]
    h = xn @ p["w1"] + p["b1"]
    h = jnp.where(h >= 0, h, 1.0 * h)            # LeakyReLU(negative_slope=1) == identity
    y = h @ p["w3"] + p["b3"]
    flat = y.reshape(-1)                         # torch.roll with dims=None flattens first
    s = sum(jnp.roll(flat, k) for k in range(-_TAPS, _TAPS + 1)) / 7.0
    return 2.0 * jnp.pi * jax.nn.sigmoid(s.reshape(y.shape))


if __name__ == "__main__":
    # Small, lane-dense shapes (last dims multiples of 128 -> full vregs, no masking).
    B, input_size, n, output_size = 8, 256, 128, 128
    key = jax.random.PRNGKey(0)
    kx, kp = jax.random.split(key)
    x = jax.random.normal(kx, (B, input_size), jnp.float32)
    params = init_params(kp, input_size, n, output_size)

    out = jax.jit(network_12_forward)(x, params)
    out = jax.block_until_ready(out)

    ref = reference_forward(x, params)
    assert out.shape == (B, output_size)
    err = float(jnp.max(jnp.abs(out - ref)))
    assert err < 1e-3, f"Pallas output mismatch vs JAX reference (max abs err {err})"
    print("KERNEL_OK")
</pallas_src>

<mosaic_0001>
module attributes {stable_mosaic.version = 11 : i64} {
  func.func @_network12_kernel(%arg0: memref<8x256xf32, #tpu.memory_space<vmem>>, %arg1: memref<256x128xf32, #tpu.memory_space<vmem>>, %arg2: memref<256x128xf32, #tpu.memory_space<vmem>>, %arg3: memref<256x128xf32, #tpu.memory_space<vmem>>, %arg4: memref<1x128xf32, #tpu.memory_space<vmem>>, %arg5: memref<8x128xf32, #tpu.memory_space<vmem>>) attributes {dimension_semantics = [], scalar_prefetch = 0 : i64, scratch_operands = 0 : i64, tpu.core_type = #tpu.core_type<tc>} {
    %c0 = arith.constant 0 : index
    %c0_0 = arith.constant 0 : index
    %0 = vector.load %arg0[%c0, %c0_0] : memref<8x256xf32, #tpu.memory_space<vmem>>, vector<8x256xf32>
    %cst = arith.constant dense<0.000000e+00> : vector<8xf32>
    %1 = vector.multi_reduction <add>, %0, %cst [1] : vector<8x256xf32> to vector<8xf32>
    %2 = vector.shape_cast %1 : vector<8xf32> to vector<8x1xf32>
    %cst_1 = arith.constant 2.560000e+02 : f32
    %3 = vector.broadcast %cst_1 : f32 to vector<8x1xf32>
    %4 = arith.divf %2, %3 : vector<8x1xf32>
    %5 = vector.broadcast %4 : vector<8x1xf32> to vector<8x256xf32>
    %6 = arith.subf %0, %5 : vector<8x256xf32>
    %7 = arith.mulf %6, %6 : vector<8x256xf32>
    %cst_2 = arith.constant dense<0.000000e+00> : vector<8xf32>
    %8 = vector.multi_reduction <add>, %7, %cst_2 [1] : vector<8x256xf32> to vector<8xf32>
    %9 = vector.shape_cast %8 : vector<8xf32> to vector<8x1xf32>
    %cst_3 = arith.constant 2.560000e+02 : f32
    %10 = vector.broadcast %cst_3 : f32 to vector<8x1xf32>
    %11 = arith.divf %9, %10 : vector<8x1xf32>
    %cst_4 = arith.constant 9.99999974E-6 : f32
    %12 = vector.broadcast %cst_4 : f32 to vector<8x1xf32>
    %13 = arith.addf %11, %12 : vector<8x1xf32>
    %14 = math.rsqrt %13 : vector<8x1xf32>
    %15 = vector.broadcast %14 : vector<8x1xf32> to vector<8x256xf32>
    %16 = arith.mulf %6, %15 : vector<8x256xf32>
    %c1_i32 = arith.constant 1 : i32
    %17 = tpu.dynamic_rotate %16 by %c1_i32 dim 0 : vector<8x256xf32>, i32 -> vector<8x256xf32>
    %c7_i32 = arith.constant 7 : i32
    %18 = tpu.dynamic_rotate %16 by %c7_i32 dim 0 : vector<8x256xf32>, i32 -> vector<8x256xf32>
    %c0_5 = arith.constant 0 : index
    %c0_6 = arith.constant 0 : index
    %19 = vector.load %arg1[%c0_5, %c0_6] : memref<256x128xf32, #tpu.memory_space<vmem>>, vector<256x128xf32>
    %cst_7 = arith.constant dense<0.000000e+00> : vector<8x128xf32>
    %20 = tpu.matmul %16, %19, %cst_7 {dimension_numbers = #tpu.dot_dimension_numbers<[1], [0], [0], [1], [0, 0, 1, 1], [], []>} : vector<8x256xf32>, vector<256x128xf32>, vector<8x128xf32> -> vector<8x128xf32>
    %c0_8 = arith.constant 0 : index
    %c0_9 = arith.constant 0 : index
    %21 = vector.load %arg2[%c0_8, %c0_9] : memref<256x128xf32, #tpu.memory_space<vmem>>, vector<256x128xf32>
    %cst_10 = arith.constant dense<0.000000e+00> : vector<8x128xf32>
    %22 = tpu.matmul %17, %21, %cst_10 {dimension_numbers = #tpu.dot_dimension_numbers<[1], [0], [0], [1], [0, 0, 1, 1], [], []>} : vector<8x256xf32>, vector<256x128xf32>, vector<8x128xf32> -> vector<8x128xf32>
    %23 = arith.addf %20, %22 : vector<8x128xf32>
    %c0_11 = arith.constant 0 : index
    %c0_12 = arith.constant 0 : index
    %24 = vector.load %arg3[%c0_11, %c0_12] : memref<256x128xf32, #tpu.memory_space<vmem>>, vector<256x128xf32>
    %cst_13 = arith.constant dense<0.000000e+00> : vector<8x128xf32>
    %25 = tpu.matmul %18, %24, %cst_13 {dimension_numbers = #tpu.dot_dimension_numbers<[1], [0], [0], [1], [0, 0, 1, 1], [], []>} : vector<8x256xf32>, vector<256x128xf32>, vector<8x128xf32> -> vector<8x128xf32>
    %26 = arith.addf %23, %25 : vector<8x128xf32>
    %c0_14 = arith.constant 0 : index
    %c0_15 = arith.constant 0 : index
    %27 = vector.load %arg4[%c0_14, %c0_15] : memref<1x128xf32, #tpu.memory_space<vmem>>, vector<1x128xf32>
    %28 = vector.broadcast %27 : vector<1x128xf32> to vector<8x128xf32>
    %29 = arith.addf %26, %28 : vector<8x128xf32>
    %30 = arith.negf %29 : vector<8x128xf32>
    %31 = math.exp %30 : vector<8x128xf32>
    %cst_16 = arith.constant 1.000000e+00 : f32
    %32 = vector.broadcast %cst_16 : f32 to vector<8x128xf32>
    %33 = arith.addf %32, %31 : vector<8x128xf32>
    %34 = arith.divf %32, %33 : vector<8x128xf32>
    %cst_17 = arith.constant 6.28318548 : f32
    %35 = vector.broadcast %cst_17 : f32 to vector<8x128xf32>
    %36 = arith.mulf %35, %34 : vector<8x128xf32>
    %c0_18 = arith.constant 0 : index
    %c0_19 = arith.constant 0 : index
    %37 = vector.load %arg5[%c0_18, %c0_19] : memref<8x128xf32, #tpu.memory_space<vmem>>, vector<8x128xf32>
    tpu.vector_store %arg5[%c0_18, %c0_19], %36 {strides = array<i32>} : memref<8x128xf32, #tpu.memory_space<vmem>>, vector<8x128xf32>,
    return
  }
}

</mosaic_0001>

<bundles_post_ra>
// kernel: network_12_forward.1
= control target key start
LH: loop header
LB: loop body
LE: loop exit
PB: predicated region body
PF: predicated region fallthrough
CT: control target
= control target key end

     0   :  { %10 = vsyncpa [#allocation3], 0  ;;  %s744_s0 = inlined_call_operand.hbm [shape: f32[8,256], index: 0, kind: input, shape index: {}]   ;;  %s745_s1 = inlined_call_operand.hbm [shape: f32[256,128], index: 1, kind: input, shape index: {}]   ;;  %s746_s2 = inlined_call_operand.hbm [shape: f32[256,128], index: 2, kind: input, shape index: {}]   ;;  %s747_s3 = inlined_call_operand.hbm [shape: f32[256,128], index: 3, kind: input, shape index: {}]   ;;  %s748_s4 = inlined_call_operand.vmem [shape: f32[1,128], index: 4, kind: input, shape index: {}]   ;;  %s749_s5 = inlined_call_operand.hbm [shape: f32[8,128], index: 5, kind: output, shape index: {}]  }
   0x1   :  { %11 = vsyncpa [#allocation6], 0 }
   0x2   :  { %12 = vsyncpa [#allocation9], 0 }
   0x3   :  { %13 = vsyncpa [#allocation4], 0  ;;  %s665_s18 = smov [#allocation5]  }
   0x4   :  { %s29_s19 = sshll.u32 %s665_s18, 4  ;;  %s30_s19 = int_to_ptr.vmem [resolvable:$true] %s29_s19 }
   0x5   :  { %s565_s20 = scalar_lea.vmem %s30_s19, 4096  ;;  %p570_p1 = scmp.lt.s32.totalorder %s30_s19, %s30_s19 }
   0x6   :  { %p566_p0 = scmp.ne.s32.totalorder %s30_s19, %s565_s20  ;;  %p571_p2 = scmp.lt.s32.totalorder %s565_s20, %s565_s20 }
   0x8   :  { %p572_p3 = por %p571_p2, %p570_p1 }
   0xa   :  { %p573_p4 = pnand %p572_p3, %p566_p0 }
   0xc   :  { %576 = shalt.err (!%p573_p4)
}
   0xd   :  { %s666_s21 = smov 128   ;;  %s667_s22 = smov 8  }
   0xe   :  { %35 = dma.hbm_to_vmem [thread:$0]  %s745_s1, 4096, %s30_s19, [#allocation6], %s666_s21, %s666_s21, %s667_s22  }
   0xf   :  { %s668_s25 = smov [#allocation2]   ;;  %s669_s27 = smov [#allocation7]  }
  0x10   :  { %s20_s26 = sshll.u32 %s668_s25, 4  ;;  %s41_s28 = sshll.u32 %s669_s27, 4  ;;  %s21_s26 = int_to_ptr.vmem [resolvable:$true] %s20_s26  ;;  %s42_s28 = int_to_ptr.vmem [resolvable:$true] %s41_s28 }
  0x11   :  { %s585_s29 = scalar_lea.vmem %s21_s26, 256  ;;  %p590_p6 = scmp.lt.s32.totalorder %s21_s26, %s21_s26 }
  0x12   :  { %p586_p5 = scmp.ne.s32.totalorder %s21_s26, %s585_s29  ;;  %p591_p7 = scmp.lt.s32.totalorder %s585_s29, %s585_s29 }
  0x14   :  { %p592_p8 = por %p591_p7, %p590_p6 }
  0x16   :  { %p593_p9 = pnand %p592_p8, %p586_p5 }
  0x18   :  { %596 = shalt.err (!%p593_p9)
}
  0x19   :  { %23 = dma.hbm_to_vmem [thread:$0]  %s744_s0, 256, %s21_s26, [#allocation3]  }
  0x1a   :  { %s605_s7 = scalar_lea.vmem %s42_s28, 4096  ;;  %p610_p11 = scmp.lt.s32.totalorder %s42_s28, %s42_s28 }
  0x1b   :  { %p606_p10 = scmp.ne.s32.totalorder %s42_s28, %s605_s7  ;;  %p611_p12 = scmp.lt.s32.totalorder %s605_s7, %s605_s7 }
  0x1d   :  { %p612_p13 = por %p611_p12, %p610_p11 }
  0x1f   :  { %p613_p0 = pnand %p612_p13, %p606_p10 }
  0x21   :  { %616 = shalt.err (!%p613_p0)
}
  0x22   :  { %47 = dma.hbm_to_vmem [thread:$0]  %s746_s2, 4096, %s42_s28, [#allocation6], %s666_s21, %s666_s21, %s667_s22  }
  0x23   :  { %s670_s9 = smov [#allocation8]  }
  0x24   :  { %s53_s10 = sshll.u32 %s670_s9, 4  ;;  %s54_s10 = int_to_ptr.vmem [resolvable:$true] %s53_s10 }
  0x25   :  { %s625_s11 = scalar_lea.vmem %s54_s10, 4096  ;;  %p630_p2 = scmp.lt.s32.totalorder %s54_s10, %s54_s10 }
  0x26   :  { %p626_p1 = scmp.ne.s32.totalorder %s54_s10, %s625_s11  ;;  %p631_p3 = scmp.lt.s32.totalorder %s625_s11, %s625_s11 }
  0x28   :  { %p632_p4 = por %p631_p3, %p630_p2 }
  0x2a   :  { %p633_p5 = pnand %p632_p4, %p626_p1 }
  0x2c   :  { %636 = shalt.err (!%p633_p5)
}
  0x2d   :  { %59 = dma.hbm_to_vmem [thread:$0]  %s747_s3, 4096, %s54_s10, [#allocation9], %s666_s21, %s666_s21, %s667_s22  }
  0x2e   :  { %657 = dma.done.wait [#allocation3], 256  }
  0x2f   :  { %658 = vsyncadd [#allocation3], 4294967040 }
  0x30   :  { %659 = dma.done.wait [#allocation6], 8192  }
  0x31   :  { %660 = vsyncadd [#allocation6], 4294959104 }
  0x32   :  { %661 = dma.done.wait [#allocation9], 4096  }
  0x33   :  { %662 = vsyncadd [#allocation9], 4294963200  ;;  %v74_v0 = vld [vmem:[#allocation2] sm:$0xff]  ;;  %v75_v1 = vld [vmem:[#allocation2 + $0x8] sm:$0xff]  ;;  %s671_s13 = smov [#allocation10]  }
  0x34   :  { %v76_v2 = vadd.f32 %v75_v1, %v74_v0  ;;  %v128_v3 = vld [vmem:[#allocation5 + $0xf8] sm:$0xff]  ;;  %v127_v7 = vld [vmem:[#allocation5 + $0xf0] sm:$0xff]  ;;  %v126_v11 = vld [vmem:[#allocation5 + $0xe8] sm:$0xff]  ;;  %s426_s14 = sshll.u32 %s671_s13, 4  ;;  %s427_s14 = int_to_ptr.vmem [resolvable:$true] %s426_s14 }
  0x35   :  { %v160_v4 = vld [vmem:[#allocation7 + $0xf8] sm:$0xff]  ;;  %474 = vmatprep.subr.mxu1 %v128_v3  ;;  %v159_v8 = vld [vmem:[#allocation7 + $0xf0] sm:$0xff]  ;;  %v158_v12 = vld [vmem:[#allocation7 + $0xe8] sm:$0xff]  ;;  %s637_s15 = scalar_lea.vmem %s427_s14, 128  ;;  %p642_p7 = scmp.lt.s32.totalorder %s427_s14, %s427_s14 }
  0x36   :  { %77 = vadd.xlane.f32.xlu0 %v76_v2  ;;  %v112_v5 = vld [vmem:[#allocation5 + $0x78] sm:$0xff]  ;;  %439 = vmatprep.subr.mxu0 %v160_v4  ;;  %v111_v9 = vld [vmem:[#allocation5 + $0x70] sm:$0xff]  ;;  %v110_v13 = vld [vmem:[#allocation5 + $0x68] sm:$0xff]  ;;  %p638_p6 = scmp.ne.s32.totalorder %s427_s14, %s637_s15  ;;  %p643_p8 = scmp.lt.s32.totalorder %s637_s15, %s637_s15 }
  0x37   :  { %v144_v6 = vld [vmem:[#allocation7 + $0x78] sm:$0xff]  ;;  %475 = vmatpush3.msra.mxu1 %v112_v5  ;;  %v143_v10 = vld [vmem:[#allocation7 + $0x70] sm:$0xff]  ;;  %v142_v14 = vld [vmem:[#allocation7 + $0x68] sm:$0xff] }
  0x38   :  { %440 = vmatpush3.msra.mxu0 %v144_v6  ;;  %476 = vmatprep.subr.mxu1 %v127_v7  ;;  %v125_v15 = vld [vmem:[#allocation5 + $0xe0] sm:$0xff]  ;;  %v124_v19 = vld [vmem:[#allocation5 + $0xd8] sm:$0xff]  ;;  %v123_v23 = vld [vmem:[#allocation5 + $0xd0] sm:$0xff]  ;;  %p644_p9 = por %p643_p8, %p642_p7 }
  0x39   :  { %441 = vmatprep.subr.mxu0 %v159_v8  ;;  %477 = vmatpush3.msra.mxu1 %v111_v9  ;;  %v157_v16 = vld [vmem:[#allocation7 + $0xe0] sm:$0xff]  ;;  %v156_v20 = vld [vmem:[#allocation7 + $0xd8] sm:$0xff]  ;;  %v155_v31 = vld [vmem:[#allocation7 + $0xd0] sm:$0xff] }
  0x3a   :  { %442 = vmatpush3.msra.mxu0 %v143_v10  ;;  %478 = vmatprep.subr.mxu1 %v126_v11  ;;  %v109_v17 = vld [vmem:[#allocation5 + $0x60] sm:$0xff]  ;;  %v108_v21 = vld [vmem:[#allocation5 + $0x58] sm:$0xff]  ;;  %v107_v32 = vld [vmem:[#allocation5 + $0x50] sm:$0xff]  ;;  %p645_p10 = pnand %p644_p9, %p638_p6 }
  0x3b   :  { %443 = vmatprep.subr.mxu0 %v158_v12  ;;  %v141_v18 = vld [vmem:[#allocation7 + $0x60] sm:$0xff]  ;;  %479 = vmatpush3.msra.mxu1 %v110_v13  ;;  %v140_v22 = vld [vmem:[#allocation7 + $0x58] sm:$0xff]  ;;  %v139_v33 = vld [vmem:[#allocation7 + $0x50] sm:$0xff] }
  0x3c   :  { %444 = vmatpush3.msra.mxu0 %v142_v14  ;;  %480 = vmatprep.subr.mxu1 %v125_v15  ;;  %v122_v34 = vld [vmem:[#allocation5 + $0xc8] sm:$0xff]  ;;  %v121_v38 = vld [vmem:[#allocation5 + $0xc0] sm:$0xff]  ;;  %v120_v42 = vld [vmem:[#allocation5 + $0xb8] sm:$0xff] }
  0x3d   :  { %445 = vmatprep.subr.mxu0 %v157_v16  ;;  %481 = vmatpush3.msra.mxu1 %v109_v17  ;;  %v154_v35 = vld [vmem:[#allocation7 + $0xc8] sm:$0xff]  ;;  %v153_v39 = vld [vmem:[#allocation7 + $0xc0] sm:$0xff]  ;;  %v152_v43 = vld [vmem:[#allocation7 + $0xb8] sm:$0xff] }
  0x3e   :  { %446 = vmatpush3.msra.mxu0 %v141_v18  ;;  %482 = vmatprep.subr.mxu1 %v124_v19  ;;  %v106_v36 = vld [vmem:[#allocation5 + $0x48] sm:$0xff]  ;;  %v105_v40 = vld [vmem:[#allocation5 + $0x40] sm:$0xff]  ;;  %v104_v44 = vld [vmem:[#allocation5 + $0x38] sm:$0xff] }
  0x3f   :  { %447 = vmatprep.subr.mxu0 %v156_v20  ;;  %483 = vmatpush3.msra.mxu1 %v108_v21  ;;  %v138_v37 = vld [vmem:[#allocation7 + $0x48] sm:$0xff]  ;;  %v137_v41 = vld [vmem:[#allocation7 + $0x40] sm:$0xff]  ;;  %v136_v45 = vld [vmem:[#allocation7 + $0x38] sm:$0xff] }
  0x40   :  { %448 = vmatpush3.msra.mxu0 %v140_v22  ;;  %484 = vmatprep.subr.mxu1 %v123_v23  ;;  %v119_v46 = vld [vmem:[#allocation5 + $0xb0] sm:$0xff]  ;;  %v118_v50 = vld [vmem:[#allocation5 + $0xa8] sm:$0xff]  ;;  %v117_v54 = vld [vmem:[#allocation5 + $0xa0] sm:$0xff] }
  0x41   :  { %449 = vmatprep.subr.mxu0 %v155_v31  ;;  %485 = vmatpush3.msra.mxu1 %v107_v32  ;;  %v151_v47 = vld [vmem:[#allocation7 + $0xb0] sm:$0xff]  ;;  %v150_v51 = vld [vmem:[#allocation7 + $0xa8] sm:$0xff]  ;;  %v149_v55 = vld [vmem:[#allocation7 + $0xa0] sm:$0xff] }
  0x42   :  { %450 = vmatpush3.msra.mxu0 %v139_v33  ;;  %486 = vmatprep.subr.mxu1 %v122_v34  ;;  %v103_v48 = vld [vmem:[#allocation5 + $0x30] sm:$0xff]  ;;  %v102_v52 = vld [vmem:[#allocation5 + $0x28] sm:$0xff]  ;;  %v101_v56 = vld [vmem:[#allocation5 + $0x20] sm:$0xff] }
  0x43   :  { %451 = vmatprep.subr.mxu0 %v154_v35  ;;  %487 = vmatpush3.msra.mxu1 %v106_v36  ;;  %v135_v49 = vld [vmem:[#allocation7 + $0x30] sm:$0xff]  ;;  %v134_v53 = vld [vmem:[#allocation7 + $0x28] sm:$0xff]  ;;  %v133_v57 = vld [vmem:[#allocation7 + $0x20] sm:$0xff] }
  0x44   :  { %452 = vmatpush3.msra.mxu0 %v138_v37  ;;  %488 = vmatprep.subr.mxu1 %v121_v38  ;;  %v116_v58 = vld [vmem:[#allocation5 + $0x98] sm:$0xff]  ;;  %v115_v62 = vld [vmem:[#allocation5 + $0x90] sm:$0xff]  ;;  %v114_v2 = vld [vmem:[#allocation5 + $0x88] sm:$0xff] }
  0x45   :  { %453 = vmatprep.subr.mxu0 %v153_v39  ;;  %489 = vmatpush3.msra.mxu1 %v105_v40  ;;  %v148_v59 = vld [vmem:[#allocation7 + $0x98] sm:$0xff]  ;;  %v147_v63 = vld [vmem:[#allocation7 + $0x90] sm:$0xff]  ;;  %v146_v3 = vld [vmem:[#allocation7 + $0x88] sm:$0xff] }
  0x46   :  { %454 = vmatpush3.msra.mxu0 %v137_v41  ;;  %490 = vmatprep.subr.mxu1 %v120_v42  ;;  %v100_v60 = vld [vmem:[#allocation5 + $0x18] sm:$0xff]  ;;  %v98_v4 = vld [vmem:[#allocation5 + $0x8] sm:$0xff]  ;;  %v113_v6 = vld [vmem:[#allocation5 + $0x80] sm:$0xff] }
  0x47   :  { %455 = vmatprep.subr.mxu0 %v152_v43  ;;  %491 = vmatpush3.msra.mxu1 %v104_v44  ;;  %v132_v61 = vld [vmem:[#allocation7 + $0x18] sm:$0xff]  ;;  %v130_v5 = vld [vmem:[#allocation7 + $0x8] sm:$0xff]  ;;  %v145_v7 = vld [vmem:[#allocation7 + $0x80] sm:$0xff] }
  0x48   :  { %456 = vmatpush3.msra.mxu0 %v136_v45  ;;  %492 = vmatprep.subr.mxu1 %v119_v46  ;;  %v97_v8 = vld [vmem:[#allocation5] sm:$0xff]  ;;  %v332_v10 = vld [vmem:[#allocation8 + $0xf8] sm:$0xff]  ;;  %v331_v20 = vld [vmem:[#allocation8 + $0xf0] sm:$0xff] }
  0x49   :  { %457 = vmatprep.subr.mxu0 %v151_v47  ;;  %493 = vmatpush3.msra.mxu1 %v103_v48  ;;  %v129_v9 = vld [vmem:[#allocation7] sm:$0xff]  ;;  %v316_v19 = vld [vmem:[#allocation8 + $0x78] sm:$0xff]  ;;  %v315_v22 = vld [vmem:[#allocation8 + $0x70] sm:$0xff] }
  0x4a   :  { %458 = vmatpush3.msra.mxu0 %v135_v49  ;;  %494 = vmatprep.subr.mxu1 %v118_v50  ;;  %v330_v23 = vld [vmem:[#allocation8 + $0xe8] sm:$0xff]  ;;  %v325_v33 = vld [vmem:[#allocation8 + $0xc0] sm:$0xff]  ;;  %v324_v35 = vld [vmem:[#allocation8 + $0xb8] sm:$0xff] }
  0x4b   :  { %459 = vmatprep.subr.mxu0 %v150_v51  ;;  %495 = vmatpush3.msra.mxu1 %v102_v52  ;;  %v326_v31 = vld [vmem:[#allocation8 + $0xc8] sm:$0xff]  ;;  %v309_v34 = vld [vmem:[#allocation8 + $0x40] sm:$0xff]  ;;  %v308_v36 = vld [vmem:[#allocation8 + $0x38] sm:$0xff] }
  0x4c   :  { %460 = vmatpush3.msra.mxu0 %v134_v53  ;;  %496 = vmatprep.subr.mxu1 %v117_v54  ;;  %v310_v32 = vld [vmem:[#allocation8 + $0x48] sm:$0xff]  ;;  %v323_v37 = vld [vmem:[#allocation8 + $0xb0] sm:$0xff]  ;;  %v321_v41 = vld [vmem:[#allocation8 + $0xa0] sm:$0xff] }
  0x4d   :  { %461 = vmatprep.subr.mxu0 %v149_v55  ;;  %497 = vmatpush3.msra.mxu1 %v101_v56  ;;  %v307_v38 = vld [vmem:[#allocation8 + $0x30] sm:$0xff]  ;;  %v322_v39 = vld [vmem:[#allocation8 + $0xa8] sm:$0xff]  ;;  %v305_v42 = vld [vmem:[#allocation8 + $0x20] sm:$0xff] }
  0x4e   :  { %462 = vmatpush3.msra.mxu0 %v133_v57  ;;  %498 = vmatprep.subr.mxu1 %v116_v58  ;;  %v306_v40 = vld [vmem:[#allocation8 + $0x28] sm:$0xff]  ;;  %v320_v43 = vld [vmem:[#allocation8 + $0x98] sm:$0xff]  ;;  %v319_v45 = vld [vmem:[#allocation8 + $0x90] sm:$0xff] }
  0x4f   :  { %463 = vmatprep.subr.mxu0 %v148_v59  ;;  %499 = vmatpush3.msra.mxu1 %v100_v60  ;;  %v304_v44 = vld [vmem:[#allocation8 + $0x18] sm:$0xff]  ;;  %v303_v46 = vld [vmem:[#allocation8 + $0x10] sm:$0xff]  ;;  %v318_v47 = vld [vmem:[#allocation8 + $0x88] sm:$0xff] }
  0x50   :  { %464 = vmatpush3.msra.mxu0 %v132_v61  ;;  %500 = vmatprep.subr.mxu1 %v115_v62  ;;  %v302_v48 = vld [vmem:[#allocation8 + $0x8] sm:$0xff]  ;;  %v317_v49 = vld [vmem:[#allocation8 + $0x80] sm:$0xff]  ;;  %v437_v62 = vld [vmem:[%s748_s4] ss:$0 sm:$0xff] }
  0x51   :  { %465 = vmatprep.subr.mxu0 %v147_v63  ;;  %v301_v50 = vld [vmem:[#allocation8] sm:$0xff] }
  0xbf   :  { %v78_v24 = vpop.xlane.xlu0 %77 }
  0xc0   :  { %v80_v25 = vmul.f32 0.00390625, %v78_v24  ;;  %v314_v24 = vld [vmem:[#allocation8 + $0x68] sm:$0xff] }
  0xc2   :  { %v723_v26 = vsub.f32 %v74_v0, %v80_v25  ;;  %v725_v27 = vsub.f32 %v75_v1, %v80_v25  ;;  %v99_v0 = vld [vmem:[#allocation5 + $0x10] sm:$0xff]  ;;  %v329_v25 = vld [vmem:[#allocation8 + $0xe0] sm:$0xff] }
  0xc3   :  { %v131_v1 = vld [vmem:[#allocation7 + $0x10] sm:$0xff]  ;;  %501 = vmatpush3.msra.mxu1 %v99_v0 }
  0xc4   :  { %v83_v28 = vmul.f32 %v723_v26, %v723_v26  ;;  %v84_v29 = vmul.f32 %v725_v27, %v725_v27  ;;  %466 = vmatpush3.msra.mxu0 %v131_v1  ;;  %502 = vmatprep.subr.mxu1 %v114_v2 }
  0xc5   :  { %467 = vmatprep.subr.mxu0 %v146_v3  ;;  %503 = vmatpush3.msra.mxu1 %v98_v4 }
  0xc6   :  { %v85_v30 = vadd.f32 %v84_v29, %v83_v28  ;;  %468 = vmatpush3.msra.mxu0 %v130_v5  ;;  %504 = vmatprep.subr.mxu1 %v113_v6  ;;  %v312_v28 = vld [vmem:[#allocation8 + $0x58] sm:$0xff]  ;;  %v327_v29 = vld [vmem:[#allocation8 + $0xd0] sm:$0xff] }
  0xc7   :  { %469 = vmatprep.subr.mxu0 %v145_v7  ;;  %505 = vmatpush3.msra.mxu1 %v97_v8 }
  0xc8   :  { %86 = vadd.xlane.f32.xlu0 %v85_v30  ;;  %470 = vmatpush3.msra.mxu0 %v129_v9  ;;  %v311_v30 = vld [vmem:[#allocation8 + $0x50] sm:$0xff] }
  0xc9   :  { %509 = vmatprep.subr.mxu0 %v332_v10 }
 0x151   :  { %v87_v11 = vpop.xlane.xlu0 %86 }
 0x152   :  { %v88_v12 = vmul.f32 0.00390625, %v87_v11 }
 0x154   :  { %v89_v13 = vadd.f32 1e-05, %v88_v12 }
 0x156   :  { %551 = vrsqrt.f32 %v89_v13 }
 0x163   :  { %v552_v14 = vpop.eup %551 }
 0x164   :  { %v92_v15 = vmul.f32 %v552_v14, %v725_v27  ;;  %v733_v16 = vmul.f32 %v552_v14, %v723_v26  ;;  %v313_v26 = vld [vmem:[#allocation8 + $0x60] sm:$0xff]  ;;  %v328_v27 = vld [vmem:[#allocation8 + $0xd8] sm:$0xff] }
 0x166   :  { %295 = vmatprep.mubr.f32.mxu1 %v92_v15  ;;  %v94_v17 = vrot.slane %v92_v15, 7  ;;  %v93_v18 = vrot.slane %v733_v16, 7  ;;  %v96_v21 = vrot.slane %v92_v15, 1  ;;  %v95_v51 = vrot.slane %v733_v16, 1 }
 0x167   :  { %296 = vmatmul.mubr.f32.vlgmr.msra.gmra.mxu1 %v733_v16 }
 0x168   :  { %225 = vmatprep.mubr.f32.mxu0 %v94_v17 }
 0x169   :  { %226 = vmatmul.mubr.f32.vlgmr.msra.gmra.mxu0 %v93_v18 }
 0x16a   :  { %510 = vmatpush3.msra.mxu0 %v316_v19  ;;  %397 = vmatprep.mubr.f32.mxu0 %v96_v21 }
 0x16b   :  { %511 = vmatprep.subr.mxu0 %v331_v20 }
 0x16c   :  { %512 = vmatpush3.msra.mxu0 %v315_v22 }
 0x16d   :  { %513 = vmatprep.subr.mxu0 %v330_v23 }
 0x16e   :  { %514 = vmatpush3.msra.mxu0 %v314_v24 }
 0x16f   :  { %515 = vmatprep.subr.mxu0 %v329_v25 }
 0x170   :  { %516 = vmatpush3.msra.mxu0 %v313_v26 }
 0x171   :  { %517 = vmatprep.subr.mxu0 %v328_v27 }
 0x172   :  { %518 = vmatpush3.msra.mxu0 %v312_v28 }
 0x173   :  { %519 = vmatprep.subr.mxu0 %v327_v29 }
 0x174   :  { %520 = vmatpush3.msra.mxu0 %v311_v30 }
 0x175   :  { %521 = vmatprep.subr.mxu0 %v326_v31 }
 0x176   :  { %522 = vmatpush3.msra.mxu0 %v310_v32 }
 0x177   :  { %523 = vmatprep.subr.mxu0 %v325_v33 }
 0x178   :  { %524 = vmatpush3.msra.mxu0 %v309_v34 }
 0x179   :  { %525 = vmatprep.subr.mxu0 %v324_v35 }
 0x17a   :  { %526 = vmatpush3.msra.mxu0 %v308_v36 }
 0x17b   :  { %527 = vmatprep.subr.mxu0 %v323_v37 }
 0x17c   :  { %528 = vmatpush3.msra.mxu0 %v307_v38 }
 0x17d   :  { %529 = vmatprep.subr.mxu0 %v322_v39 }
 0x17e   :  { %530 = vmatpush3.msra.mxu0 %v306_v40 }
 0x17f   :  { %531 = vmatprep.subr.mxu0 %v321_v41 }
 0x180   :  { %532 = vmatpush3.msra.mxu0 %v305_v42 }
 0x181   :  { %533 = vmatprep.subr.mxu0 %v320_v43 }
 0x182   :  { %534 = vmatpush3.msra.mxu0 %v304_v44 }
 0x183   :  { %535 = vmatprep.subr.mxu0 %v319_v45 }
 0x184   :  { %536 = vmatpush3.msra.mxu0 %v303_v46 }
 0x185   :  { %537 = vmatprep.subr.mxu0 %v318_v47 }
 0x186   :  { %538 = vmatpush3.msra.mxu0 %v302_v48 }
 0x187   :  { %539 = vmatprep.subr.mxu0 %v317_v49 }
 0x188   :  { %540 = vmatpush3.msra.mxu0 %v301_v50 }
 0x189   :  { %398 = vmatmul.mubr.f32.vlgmr.msra.gmra.mxu0 %v95_v51 }
 0x227   :  { %v506_v53 = vpop.f32.mrf.mxu1 }
 0x229   :  { %v471_v52 = vpop.f32.mrf.mxu0  ;;  %v507_v55 = vpop.f32.mrf.mxu1 }
 0x22a   :  { %v508_v58 = vadd.f32 %v507_v55, %v506_v53 }
 0x22b   :  { %v472_v54 = vpop.f32.mrf.mxu0 }
 0x22c   :  { %v473_v56 = vadd.f32 %v472_v54, %v471_v52 }
 0x22e   :  { %v298_v60 = vadd.f32 %v508_v58, %v473_v56 }
 0x249   :  { %v541_v57 = vpop.f32.mrf.mxu0 }
 0x24b   :  { %v542_v59 = vpop.f32.mrf.mxu0 }
 0x24c   :  { %v543_v61 = vadd.f32 %v542_v59, %v541_v57 }
 0x24e   :  { %v403_v63 = vadd.f32 %v543_v61, %v298_v60 }
 0x250   :  { %v411_v0 = vadd.f32 %v437_v62, %v403_v63 }
 0x252   :  { %v438_v1 = vmul.f32 -1.442695, %v411_v0 }
 0x254   :  { %553 = vpow2.f32 %v438_v1 }
 0x261   :  { %v554_v2 = vpop.eup %553 }
 0x262   :  { %v415_v3 = vadd.f32 1.0, %v554_v2 }
 0x264   :  { %555 = vrcp.f32 %v415_v3 }
 0x271   :  { %v556_v4 = vpop.eup %555 }
 0x272   :  { %v418_v5 = vmul.f32 6.2831855, %v556_v4 }
 0x274   :  { %419 = vst [vmem:[#allocation10] sm:$0xff] %v418_v5 }
 0x275   :  { %648 = shalt.err (!%p645_p10)
}
 0x276   :  { %429 = dma.vmem_to_hbm [thread:$0]  %s427_s14, 128, %s749_s5, [#allocation4]  }
 0x277   :  { %663 = dma.done.wait [#allocation4], 128  }
 0x278   :  { %664 = vsyncadd [#allocation4], 4294967168 }
 0x279   :  { %433 = vsyncpa [#allocation3], 1 }
 0x27a   :  { %434 = vsyncpa [#allocation6], 1 }
 0x27b   :  { %435 = vsyncpa [#allocation9], 1 }
 0x27c   :  { %436 = vsyncpa [#allocation4], 1 }

</bundles_post_ra>
